<compile_context>
chip_gen: v7x
topology: tpu7x:2x2x1
jax: 0.10.0
libtpu: 0.0.40
codegen_flags: <defaults>
</compile_context>

<pallas_src>
import functools

import jax
import jax.numpy as jnp
from jax.experimental import pallas as pl
from jax.experimental.pallas import tpu as pltpu

# ----------------------------- model config ---------------------------------
INPUT_DIM = 5
HIDDEN_DIMS = [64, 32, 16]
LATENT_DIM = 8
N_CLUSTERS = 4
ALPHA = 1.0
BN_EPS = 1e-5
BN_SCALE = 1.0 / (1.0 + BN_EPS) ** 0.5   # eval-mode BatchNorm1d, default stats

_ENC_DIMS = [INPUT_DIM] + HIDDEN_DIMS + [LATENT_DIM]
_DEC_DIMS = [LATENT_DIM] + HIDDEN_DIMS[::-1] + [INPUT_DIM]
_LAYER_DIMS = list(zip(_ENC_DIMS[:-1], _ENC_DIMS[1:])) + \
              list(zip(_DEC_DIMS[:-1], _DEC_DIMS[1:]))
_N_ENC = len(_ENC_DIMS) - 1          # 4 encoder linears
_N_LAYERS = len(_LAYER_DIMS)         # 8 linears total
# BN+ReLU(+Dropout) follow every linear except the last encoder linear and the
# last decoder linear.
_HAS_ACT = [i != _N_ENC - 1 and i != _N_LAYERS - 1 for i in range(_N_LAYERS)]

# Packed output slab layout: one [B, 32] f32 array (32 = full array width, so
# the lane-dim rule is satisfied and the writeback is a single contiguous DMA).
_RECON_OFF = 0          # cols [0, 5)   : reconstruction
_LATENT_OFF = 8         # cols [8, 16)  : latent
_Q_OFF = 16             # cols [16, 20) : cluster probabilities
_OUT_WIDTH = 32         # unused lanes zeroed in-kernel, discarded in wrapper


def _round_up(n: int, m: int) -> int:
    return ((n + m - 1) // m) * m


# ------------------------------- kernel -------------------------------------
def dec_kernel(*refs):
    # refs = [x, W0, b0, ..., W7, b7, centers_T, centers_sq, out]
    x_ref = refs[0]
    ws = [refs[1 + 2 * i] for i in range(_N_LAYERS)]
    bs = [refs[2 + 2 * i] for i in range(_N_LAYERS)]
    ct_ref = refs[1 + 2 * _N_LAYERS]      # [LATENT_DIM, N_CLUSTERS] (pre-transposed)
    csq_ref = refs[2 + 2 * _N_LAYERS]     # [1, N_CLUSTERS]          (precomputed ||c||^2)
    out_ref = refs[3 + 2 * _N_LAYERS]     # [TILE_B, _OUT_WIDTH] packed output

    h = x_ref[...]
    latent = None
    for i in range(_N_LAYERS):                       # unrolled at trace time
        h = jnp.dot(h, ws[i][...], preferred_element_type=jnp.float32) + bs[i][...]
        if _HAS_ACT[i]:
            # eval-mode BN scale already folded into W/b; Dropout is identity.
            h = jnp.maximum(h, 0.0)
        if i == _N_ENC - 1:
            latent = h
    recon = h

    # Soft assignment via student-t kernel over squared distances
    # (expanded form, MXU matmul; clamp against tiny negative cancellation).
    lat_sq = jnp.sum(latent * latent, axis=1, keepdims=True)                  # [B, 1]
    cross = jnp.dot(latent, ct_ref[...], preferred_element_type=jnp.float32)  # [B, K]
    dist = jnp.maximum(lat_sq - 2.0 * cross + csq_ref[...], 0.0)
    if ALPHA != 1.0:
        dist = dist * (1.0 / ALPHA)
    q = pl.reciprocal(1.0 + dist, approx=False)
    power = (ALPHA + 1.0) / 2.0
    if power != 1.0:                                 # alpha=1 -> power 1, skip
        q = q ** power
    q = q * pl.reciprocal(jnp.sum(q, axis=1, keepdims=True), approx=False)

    # Packed output slab: zero the pad lanes once, then the three sub-stores.
    out_ref[...] = jnp.zeros_like(out_ref)
    out_ref[:, _RECON_OFF:_RECON_OFF + INPUT_DIM] = recon
    out_ref[:, _LATENT_OFF:_LATENT_OFF + LATENT_DIM] = latent
    out_ref[:, _Q_OFF:_Q_OFF + N_CLUSTERS] = q


# ------------------------------ wrapper --------------------------------------
@functools.partial(jax.jit, static_argnames=("max_tile_b",))
def dec_forward(x, params, centers, max_tile_b=2048):
    B = x.shape[0]
    tile_b = min(max_tile_b, _round_up(B, 8))        # multiple of 8 (f32 sublane)
    Bp = _round_up(B, tile_b)
    if Bp != B:
        x = jnp.pad(x, ((0, Bp - B), (0, 0)))        # zero-pad; rows discarded below

    # Fold eval-mode BatchNorm1d scale into the preceding Linear (exact).
    # TODO(synk): if trained running_mean/var/gamma/beta exist, fold them into
    #             W/b here the same way instead of the default-stats scale.
    flat_inputs = [x]
    for i, (w, b) in enumerate(params):
        if _HAS_ACT[i]:
            w = w * BN_SCALE
            b = b * BN_SCALE
        flat_inputs += [w, b]

    # Precompute the loop-invariant pieces of the soft assignment outside the
    # kernel: centers transposed for the MXU matmul, and ||c||^2 per cluster.
    centers_t = centers.T                                   # [LATENT_DIM, K]
    c_sq = jnp.sum(centers * centers, axis=1)[None, :]      # [1, K]
    flat_inputs += [centers_t, c_sq]

    resident = lambda i: (0, 0)                             # stays in VMEM across steps
    in_specs = [pl.BlockSpec((tile_b, INPUT_DIM), lambda i: (i, 0))]
    for w, b in params:
        in_specs.append(pl.BlockSpec(w.shape, resident))
        in_specs.append(pl.BlockSpec(b.shape, resident))
    in_specs.append(pl.BlockSpec((LATENT_DIM, N_CLUSTERS), resident))
    in_specs.append(pl.BlockSpec((1, N_CLUSTERS), resident))

    out = pl.pallas_call(
        dec_kernel,
        out_shape=jax.ShapeDtypeStruct((Bp, _OUT_WIDTH), jnp.float32),
        grid=(Bp // tile_b,),
        in_specs=in_specs,
        out_specs=pl.BlockSpec((tile_b, _OUT_WIDTH), lambda i: (i, 0)),
        compiler_params=pltpu.CompilerParams(
            dimension_semantics=("parallel",)),   # v7x: shard batch over 2 TCs
    )(*flat_inputs)

    recon = out[:B, _RECON_OFF:_RECON_OFF + INPUT_DIM]
    latent = out[:B, _LATENT_OFF:_LATENT_OFF + LATENT_DIM]
    q = out[:B, _Q_OFF:_Q_OFF + N_CLUSTERS]
    return recon, latent, q


# --------------------------- parameter init ----------------------------------
def init_params(key):
    """Xavier-uniform weights, zero biases, small deterministic cluster centers."""
    params = []
    for (din, dout) in _LAYER_DIMS:
        key, kw = jax.random.split(key)
        bound = (6.0 / (din + dout)) ** 0.5
        w = jax.random.uniform(kw, (din, dout), jnp.float32, -bound, bound)
        b = jnp.zeros((1, dout), jnp.float32)
        params.append((w, b))
    key, kc = jax.random.split(key)
    # Module initializes centers to zeros; use small deterministic values here so
    # the soft-assignment path is actually exercised.
    centers = 0.1 * jax.random.normal(kc, (N_CLUSTERS, LATENT_DIM), jnp.float32)
    return params, centers


# ----------------------------- pure-JAX ref ----------------------------------
def ref_forward(x, params, centers):
    h = x
    latent = None
    for i, (w, b) in enumerate(params):
        h = h @ w + b
        if _HAS_ACT[i]:
            h = jnp.maximum(h * BN_SCALE, 0.0)
        if i == _N_ENC - 1:
            latent = h
    recon = h
    dist = jnp.sum((latent[:, None, :] - centers[None, :, :]) ** 2, axis=2)
    q = 1.0 / (1.0 + dist / ALPHA)
    q = q ** ((ALPHA + 1.0) / 2.0)
    q = q / jnp.sum(q, axis=1, keepdims=True)
    return recon, latent, q


def _check(x, params, centers, **kw):
    recon, latent, q = dec_forward(x, params, centers, **kw)
    jax.block_until_ready((recon, latent, q))
    r_ref, l_ref, q_ref = ref_forward(x, params, centers)
    B = x.shape[0]
    assert recon.shape == (B, INPUT_DIM)
    assert latent.shape == (B, LATENT_DIM)
    assert q.shape == (B, N_CLUSTERS)
    assert jnp.allclose(recon, r_ref, atol=1e-4, rtol=1e-4)
    assert jnp.allclose(latent, l_ref, atol=1e-4, rtol=1e-4)
    assert jnp.allclose(q, q_ref, atol=1e-4, rtol=1e-4)


if __name__ == "__main__":
    key = jax.random.PRNGKey(0)
    key, kx1, kx2, kp = jax.random.split(key, 4)
    params, centers = init_params(kp)

    # Small single-tile case.
    x_small = jax.random.normal(kx1, (8, INPUT_DIM), jnp.float32)
    _check(x_small, params, centers)

    # Multi-step grid + batch padding case (B not a multiple of the tile).
    x_big = jax.random.normal(kx2, (100, INPUT_DIM), jnp.float32)
    _check(x_big, params, centers, max_tile_b=64)

    print("KERNEL_OK")
</pallas_src>

<mosaic_0001>
module attributes {stable_mosaic.version = 11 : i64} {
  func.func @dec_kernel(%arg0: i32, %arg1: memref<8x5xf32, #tpu.memory_space<vmem>>, %arg2: memref<5x64xf32, #tpu.memory_space<vmem>>, %arg3: memref<1x64xf32, #tpu.memory_space<vmem>>, %arg4: memref<64x32xf32, #tpu.memory_space<vmem>>, %arg5: memref<1x32xf32, #tpu.memory_space<vmem>>, %arg6: memref<32x16xf32, #tpu.memory_space<vmem>>, %arg7: memref<1x16xf32, #tpu.memory_space<vmem>>, %arg8: memref<16x8xf32, #tpu.memory_space<vmem>>, %arg9: memref<1x8xf32, #tpu.memory_space<vmem>>, %arg10: memref<8x16xf32, #tpu.memory_space<vmem>>, %arg11: memref<1x16xf32, #tpu.memory_space<vmem>>, %arg12: memref<16x32xf32, #tpu.memory_space<vmem>>, %arg13: memref<1x32xf32, #tpu.memory_space<vmem>>, %arg14: memref<32x64xf32, #tpu.memory_space<vmem>>, %arg15: memref<1x64xf32, #tpu.memory_space<vmem>>, %arg16: memref<64x5xf32, #tpu.memory_space<vmem>>, %arg17: memref<1x5xf32, #tpu.memory_space<vmem>>, %arg18: memref<8x4xf32, #tpu.memory_space<vmem>>, %arg19: memref<1x4xf32, #tpu.memory_space<vmem>>, %arg20: memref<8x32xf32, #tpu.memory_space<vmem>>) attributes {dimension_semantics = [#tpu.dimension_semantics<parallel>], iteration_bounds = array<i64: 1>, scalar_prefetch = 0 : i64, scratch_operands = 0 : i64, tpu.core_type = #tpu.core_type<tc>, window_params = [{transform_indices = @transform_0, window_bounds = array<i64: 8, 5>}, {pipeline_mode = #tpu.pipeline_mode<synchronous>, transform_indices = @transform_1, window_bounds = array<i64: 5, 64>}, {pipeline_mode = #tpu.pipeline_mode<synchronous>, transform_indices = @transform_2, window_bounds = array<i64: 1, 64>}, {pipeline_mode = #tpu.pipeline_mode<synchronous>, transform_indices = @transform_3, window_bounds = array<i64: 64, 32>}, {pipeline_mode = #tpu.pipeline_mode<synchronous>, transform_indices = @transform_4, window_bounds = array<i64: 1, 32>}, {pipeline_mode = #tpu.pipeline_mode<synchronous>, transform_indices = @transform_5, window_bounds = array<i64: 32, 16>}, {pipeline_mode = #tpu.pipeline_mode<synchronous>, transform_indices = @transform_6, window_bounds = array<i64: 1, 16>}, {pipeline_mode = #tpu.pipeline_mode<synchronous>, transform_indices = @transform_7, window_bounds = array<i64: 16, 8>}, {pipeline_mode = #tpu.pipeline_mode<synchronous>, transform_indices = @transform_8, window_bounds = array<i64: 1, 8>}, {pipeline_mode = #tpu.pipeline_mode<synchronous>, transform_indices = @transform_9, window_bounds = array<i64: 8, 16>}, {pipeline_mode = #tpu.pipeline_mode<synchronous>, transform_indices = @transform_10, window_bounds = array<i64: 1, 16>}, {pipeline_mode = #tpu.pipeline_mode<synchronous>, transform_indices = @transform_11, window_bounds = array<i64: 16, 32>}, {pipeline_mode = #tpu.pipeline_mode<synchronous>, transform_indices = @transform_12, window_bounds = array<i64: 1, 32>}, {pipeline_mode = #tpu.pipeline_mode<synchronous>, transform_indices = @transform_13, window_bounds = array<i64: 32, 64>}, {pipeline_mode = #tpu.pipeline_mode<synchronous>, transform_indices = @transform_14, window_bounds = array<i64: 1, 64>}, {pipeline_mode = #tpu.pipeline_mode<synchronous>, transform_indices = @transform_15, window_bounds = array<i64: 64, 5>}, {pipeline_mode = #tpu.pipeline_mode<synchronous>, transform_indices = @transform_16, window_bounds = array<i64: 1, 5>}, {pipeline_mode = #tpu.pipeline_mode<synchronous>, transform_indices = @transform_17, window_bounds = array<i64: 8, 4>}, {pipeline_mode = #tpu.pipeline_mode<synchronous>, transform_indices = @transform_18, window_bounds = array<i64: 1, 4>}, {transform_indices = @transform_19, window_bounds = array<i64: 8, 32>}]} {
    %c0 = arith.constant 0 : index
    %c0_0 = arith.constant 0 : index
    %0 = vector.load %arg1[%c0, %c0_0] : memref<8x5xf32, #tpu.memory_space<vmem>>, vector<8x5xf32>
    %c0_1 = arith.constant 0 : index
    %c0_2 = arith.constant 0 : index
    %1 = vector.load %arg2[%c0_1, %c0_2] : memref<5x64xf32, #tpu.memory_space<vmem>>, vector<5x64xf32>
    %cst = arith.constant dense<0.000000e+00> : vector<8x64xf32>
    %2 = tpu.matmul %0, %1, %cst {dimension_numbers = #tpu.dot_dimension_numbers<[1], [0], [0], [1], [0, 0, 1, 1], [], []>} : vector<8x5xf32>, vector<5x64xf32>, vector<8x64xf32> -> vector<8x64xf32>
    %c0_3 = arith.constant 0 : index
    %c0_4 = arith.constant 0 : index
    %3 = vector.load %arg3[%c0_3, %c0_4] : memref<1x64xf32, #tpu.memory_space<vmem>>, vector<1x64xf32>
    %4 = vector.broadcast %3 : vector<1x64xf32> to vector<8x64xf32>
    %5 = arith.addf %2, %4 : vector<8x64xf32>
    %cst_5 = arith.constant 0.000000e+00 : f32
    %6 = vector.broadcast %cst_5 : f32 to vector<8x64xf32>
    %7 = arith.maximumf %5, %6 : vector<8x64xf32>
    %c0_6 = arith.constant 0 : index
    %c0_7 = arith.constant 0 : index
    %8 = vector.load %arg4[%c0_6, %c0_7] : memref<64x32xf32, #tpu.memory_space<vmem>>, vector<64x32xf32>
    %cst_8 = arith.constant dense<0.000000e+00> : vector<8x32xf32>
    %9 = tpu.matmul %7, %8, %cst_8 {dimension_numbers = #tpu.dot_dimension_numbers<[1], [0], [0], [1], [0, 0, 1, 1], [], []>} : vector<8x64xf32>, vector<64x32xf32>, vector<8x32xf32> -> vector<8x32xf32>
    %c0_9 = arith.constant 0 : index
    %c0_10 = arith.constant 0 : index
    %10 = vector.load %arg5[%c0_9, %c0_10] : memref<1x32xf32, #tpu.memory_space<vmem>>, vector<1x32xf32>
    %11 = vector.broadcast %10 : vector<1x32xf32> to vector<8x32xf32>
    %12 = arith.addf %9, %11 : vector<8x32xf32>
    %cst_11 = arith.constant 0.000000e+00 : f32
    %13 = vector.broadcast %cst_11 : f32 to vector<8x32xf32>
    %14 = arith.maximumf %12, %13 : vector<8x32xf32>
    %c0_12 = arith.constant 0 : index
    %c0_13 = arith.constant 0 : index
    %15 = vector.load %arg6[%c0_12, %c0_13] : memref<32x16xf32, #tpu.memory_space<vmem>>, vector<32x16xf32>
    %cst_14 = arith.constant dense<0.000000e+00> : vector<8x16xf32>
    %16 = tpu.matmul %14, %15, %cst_14 {dimension_numbers = #tpu.dot_dimension_numbers<[1], [0], [0], [1], [0, 0, 1, 1], [], []>} : vector<8x32xf32>, vector<32x16xf32>, vector<8x16xf32> -> vector<8x16xf32>
    %c0_15 = arith.constant 0 : index
    %c0_16 = arith.constant 0 : index
    %17 = vector.load %arg7[%c0_15, %c0_16] : memref<1x16xf32, #tpu.memory_space<vmem>>, vector<1x16xf32>
    %18 = vector.broadcast %17 : vector<1x16xf32> to vector<8x16xf32>
    %19 = arith.addf %16, %18 : vector<8x16xf32>
    %cst_17 = arith.constant 0.000000e+00 : f32
    %20 = vector.broadcast %cst_17 : f32 to vector<8x16xf32>
    %21 = arith.maximumf %19, %20 : vector<8x16xf32>
    %c0_18 = arith.constant 0 : index
    %c0_19 = arith.constant 0 : index
    %22 = vector.load %arg8[%c0_18, %c0_19] : memref<16x8xf32, #tpu.memory_space<vmem>>, vector<16x8xf32>
    %cst_20 = arith.constant dense<0.000000e+00> : vector<8x8xf32>
    %23 = tpu.matmul %21, %22, %cst_20 {dimension_numbers = #tpu.dot_dimension_numbers<[1], [0], [0], [1], [0, 0, 1, 1], [], []>} : vector<8x16xf32>, vector<16x8xf32>, vector<8x8xf32> -> vector<8x8xf32>
    %c0_21 = arith.constant 0 : index
    %c0_22 = arith.constant 0 : index
    %24 = vector.load %arg9[%c0_21, %c0_22] : memref<1x8xf32, #tpu.memory_space<vmem>>, vector<1x8xf32>
    %25 = vector.broadcast %24 : vector<1x8xf32> to vector<8x8xf32>
    %26 = arith.addf %23, %25 : vector<8x8xf32>
    %c0_23 = arith.constant 0 : index
    %c0_24 = arith.constant 0 : index
    %27 = vector.load %arg10[%c0_23, %c0_24] : memref<8x16xf32, #tpu.memory_space<vmem>>, vector<8x16xf32>
    %cst_25 = arith.constant dense<0.000000e+00> : vector<8x16xf32>
    %28 = tpu.matmul %26, %27, %cst_25 {dimension_numbers = #tpu.dot_dimension_numbers<[1], [0], [0], [1], [0, 0, 1, 1], [], []>} : vector<8x8xf32>, vector<8x16xf32>, vector<8x16xf32> -> vector<8x16xf32>
    %c0_26 = arith.constant 0 : index
    %c0_27 = arith.constant 0 : index
    %29 = vector.load %arg11[%c0_26, %c0_27] : memref<1x16xf32, #tpu.memory_space<vmem>>, vector<1x16xf32>
    %30 = vector.broadcast %29 : vector<1x16xf32> to vector<8x16xf32>
    %31 = arith.addf %28, %30 : vector<8x16xf32>
    %cst_28 = arith.constant 0.000000e+00 : f32
    %32 = vector.broadcast %cst_28 : f32 to vector<8x16xf32>
    %33 = arith.maximumf %31, %32 : vector<8x16xf32>
    %c0_29 = arith.constant 0 : index
    %c0_30 = arith.constant 0 : index
    %34 = vector.load %arg12[%c0_29, %c0_30] : memref<16x32xf32, #tpu.memory_space<vmem>>, vector<16x32xf32>
    %cst_31 = arith.constant dense<0.000000e+00> : vector<8x32xf32>
    %35 = tpu.matmul %33, %34, %cst_31 {dimension_numbers = #tpu.dot_dimension_numbers<[1], [0], [0], [1], [0, 0, 1, 1], [], []>} : vector<8x16xf32>, vector<16x32xf32>, vector<8x32xf32> -> vector<8x32xf32>
    %c0_32 = arith.constant 0 : index
    %c0_33 = arith.constant 0 : index
    %36 = vector.load %arg13[%c0_32, %c0_33] : memref<1x32xf32, #tpu.memory_space<vmem>>, vector<1x32xf32>
    %37 = vector.broadcast %36 : vector<1x32xf32> to vector<8x32xf32>
    %38 = arith.addf %35, %37 : vector<8x32xf32>
    %cst_34 = arith.constant 0.000000e+00 : f32
    %39 = vector.broadcast %cst_34 : f32 to vector<8x32xf32>
    %40 = arith.maximumf %38, %39 : vector<8x32xf32>
    %c0_35 = arith.constant 0 : index
    %c0_36 = arith.constant 0 : index
    %41 = vector.load %arg14[%c0_35, %c0_36] : memref<32x64xf32, #tpu.memory_space<vmem>>, vector<32x64xf32>
    %cst_37 = arith.constant dense<0.000000e+00> : vector<8x64xf32>
    %42 = tpu.matmul %40, %41, %cst_37 {dimension_numbers = #tpu.dot_dimension_numbers<[1], [0], [0], [1], [0, 0, 1, 1], [], []>} : vector<8x32xf32>, vector<32x64xf32>, vector<8x64xf32> -> vector<8x64xf32>
    %c0_38 = arith.constant 0 : index
    %c0_39 = arith.constant 0 : index
    %43 = vector.load %arg15[%c0_38, %c0_39] : memref<1x64xf32, #tpu.memory_space<vmem>>, vector<1x64xf32>
    %44 = vector.broadcast %43 : vector<1x64xf32> to vector<8x64xf32>
    %45 = arith.addf %42, %44 : vector<8x64xf32>
    %cst_40 = arith.constant 0.000000e+00 : f32
    %46 = vector.broadcast %cst_40 : f32 to vector<8x64xf32>
    %47 = arith.maximumf %45, %46 : vector<8x64xf32>
    %c0_41 = arith.constant 0 : index
    %c0_42 = arith.constant 0 : index
    %48 = vector.load %arg16[%c0_41, %c0_42] : memref<64x5xf32, #tpu.memory_space<vmem>>, vector<64x5xf32>
    %cst_43 = arith.constant dense<0.000000e+00> : vector<8x5xf32>
    %49 = tpu.matmul %47, %48, %cst_43 {dimension_numbers = #tpu.dot_dimension_numbers<[1], [0], [0], [1], [0, 0, 1, 1], [], []>} : vector<8x64xf32>, vector<64x5xf32>, vector<8x5xf32> -> vector<8x5xf32>
    %c0_44 = arith.constant 0 : index
    %c0_45 = arith.constant 0 : index
    %50 = vector.load %arg17[%c0_44, %c0_45] : memref<1x5xf32, #tpu.memory_space<vmem>>, vector<1x5xf32>
    %51 = vector.broadcast %50 : vector<1x5xf32> to vector<8x5xf32>
    %52 = arith.addf %49, %51 : vector<8x5xf32>
    %53 = arith.mulf %26, %26 : vector<8x8xf32>
    %cst_46 = arith.constant dense<0.000000e+00> : vector<8xf32>
    %54 = vector.multi_reduction <add>, %53, %cst_46 [1] : vector<8x8xf32> to vector<8xf32>
    %55 = vector.shape_cast %54 : vector<8xf32> to vector<8x1xf32>
    %c0_47 = arith.constant 0 : index
    %c0_48 = arith.constant 0 : index
    %56 = vector.load %arg18[%c0_47, %c0_48] : memref<8x4xf32, #tpu.memory_space<vmem>>, vector<8x4xf32>
    %cst_49 = arith.constant dense<0.000000e+00> : vector<8x4xf32>
    %57 = tpu.matmul %26, %56, %cst_49 {dimension_numbers = #tpu.dot_dimension_numbers<[1], [0], [0], [1], [0, 0, 1, 1], [], []>} : vector<8x8xf32>, vector<8x4xf32>, vector<8x4xf32> -> vector<8x4xf32>
    %cst_50 = arith.constant 2.000000e+00 : f32
    %58 = vector.broadcast %cst_50 : f32 to vector<8x4xf32>
    %59 = arith.mulf %58, %57 : vector<8x4xf32>
    %60 = vector.broadcast %55 : vector<8x1xf32> to vector<8x4xf32>
    %61 = arith.subf %60, %59 : vector<8x4xf32>
    %c0_51 = arith.constant 0 : index
    %c0_52 = arith.constant 0 : index
    %62 = vector.load %arg19[%c0_51, %c0_52] : memref<1x4xf32, #tpu.memory_space<vmem>>, vector<1x4xf32>
    %63 = vector.broadcast %62 : vector<1x4xf32> to vector<8x4xf32>
    %64 = arith.addf %61, %63 : vector<8x4xf32>
    %cst_53 = arith.constant 0.000000e+00 : f32
    %65 = vector.broadcast %cst_53 : f32 to vector<8x4xf32>
    %66 = arith.maximumf %64, %65 : vector<8x4xf32>
    %cst_54 = arith.constant 1.000000e+00 : f32
    %67 = vector.broadcast %cst_54 : f32 to vector<8x4xf32>
    %68 = arith.addf %67, %66 : vector<8x4xf32>
    %69 = tpu.reciprocal %68 : vector<8x4xf32> -> vector<8x4xf32>
    %cst_55 = arith.constant dense<0.000000e+00> : vector<8xf32>
    %70 = vector.multi_reduction <add>, %69, %cst_55 [1] : vector<8x4xf32> to vector<8xf32>
    %71 = vector.shape_cast %70 : vector<8xf32> to vector<8x1xf32>
    %72 = tpu.reciprocal %71 : vector<8x1xf32> -> vector<8x1xf32>
    %73 = vector.broadcast %72 : vector<8x1xf32> to vector<8x4xf32>
    %74 = arith.mulf %69, %73 : vector<8x4xf32>
    %cst_56 = arith.constant 0.000000e+00 : f32
    %75 = vector.broadcast %cst_56 : f32 to vector<8x32xf32>
    %c0_57 = arith.constant 0 : index
    %c0_58 = arith.constant 0 : index
    %76 = vector.load %arg20[%c0_57, %c0_58] : memref<8x32xf32, #tpu.memory_space<vmem>>, vector<8x32xf32>
    tpu.vector_store %arg20[%c0_57, %c0_58], %75 {strides = array<i32>} : memref<8x32xf32, #tpu.memory_space<vmem>>, vector<8x32xf32>,
    %c0_59 = arith.constant 0 : index
    %c0_60 = arith.constant 0 : index
    %77 = vector.load %arg20[%c0_59, %c0_60] : memref<8x32xf32, #tpu.memory_space<vmem>>, vector<8x5xf32>
    tpu.vector_store %arg20[%c0_59, %c0_60], %52 {strides = array<i32>} : memref<8x32xf32, #tpu.memory_space<vmem>>, vector<8x5xf32>,
    %c0_61 = arith.constant 0 : index
    %c8 = arith.constant 8 : index
    %78 = vector.load %arg20[%c0_61, %c8] : memref<8x32xf32, #tpu.memory_space<vmem>>, vector<8x8xf32>
    tpu.vector_store %arg20[%c0_61, %c8], %26 {strides = array<i32>} : memref<8x32xf32, #tpu.memory_space<vmem>>, vector<8x8xf32>,
    %c0_62 = arith.constant 0 : index
    %c16 = arith.constant 16 : index
    %79 = vector.load %arg20[%c0_62, %c16] : memref<8x32xf32, #tpu.memory_space<vmem>>, vector<8x4xf32>
    tpu.vector_store %arg20[%c0_62, %c16], %74 {strides = array<i32>} : memref<8x32xf32, #tpu.memory_space<vmem>>, vector<8x4xf32>,
    return
  }
  func.func @transform_0(%arg0: i32) -> (i32, i32) {
    %c0_i32 = arith.constant 0 : i32
    %c0_i32_0 = arith.constant 0 : i32
    return %arg0, %c0_i32 : i32, i32
  }
  func.func @transform_1(%arg0: i32) -> (i32, i32) {
    %c0_i32 = arith.constant 0 : i32
    %c0_i32_0 = arith.constant 0 : i32
    %c0_i32_1 = arith.constant 0 : i32
    return %c0_i32, %c0_i32_0 : i32, i32
  }
  func.func @transform_2(%arg0: i32) -> (i32, i32) {
    %c0_i32 = arith.constant 0 : i32
    %c0_i32_0 = arith.constant 0 : i32
    %c0_i32_1 = arith.constant 0 : i32
    return %c0_i32, %c0_i32_0 : i32, i32
  }
  func.func @transform_3(%arg0: i32) -> (i32, i32) {
    %c0_i32 = arith.constant 0 : i32
    %c0_i32_0 = arith.constant 0 : i32
    %c0_i32_1 = arith.constant 0 : i32
    return %c0_i32, %c0_i32_0 : i32, i32
  }
  func.func @transform_4(%arg0: i32) -> (i32, i32) {
    %c0_i32 = arith.constant 0 : i32
    %c0_i32_0 = arith.constant 0 : i32
    %c0_i32_1 = arith.constant 0 : i32
    return %c0_i32, %c0_i32_0 : i32, i32
  }
  func.func @transform_5(%arg0: i32) -> (i32, i32) {
    %c0_i32 = arith.constant 0 : i32
    %c0_i32_0 = arith.constant 0 : i32
    %c0_i32_1 = arith.constant 0 : i32
    return %c0_i32, %c0_i32_0 : i32, i32
  }
  func.func @transform_6(%arg0: i32) -> (i32, i32) {
    %c0_i32 = arith.constant 0 : i32
    %c0_i32_0 = arith.constant 0 : i32
    %c0_i32_1 = arith.constant 0 : i32
    return %c0_i32, %c0_i32_0 : i32, i32
  }
  func.func @transform_7(%arg0: i32) -> (i32, i32) {
    %c0_i32 = arith.constant 0 : i32
    %c0_i32_0 = arith.constant 0 : i32
    %c0_i32_1 = arith.constant 0 : i32
    return %c0_i32, %c0_i32_0 : i32, i32
  }
  func.func @transform_8(%arg0: i32) -> (i32, i32) {
    %c0_i32 = arith.constant 0 : i32
    %c0_i32_0 = arith.constant 0 : i32
    %c0_i32_1 = arith.constant 0 : i32
    return %c0_i32, %c0_i32_0 : i32, i32
  }
  func.func @transform_9(%arg0: i32) -> (i32, i32) {
    %c0_i32 = arith.constant 0 : i32
    %c0_i32_0 = arith.constant 0 : i32
    %c0_i32_1 = arith.constant 0 : i32
    return %c0_i32, %c0_i32_0 : i32, i32
  }
  func.func @transform_10(%arg0: i32) -> (i32, i32) {
    %c0_i32 = arith.constant 0 : i32
    %c0_i32_0 = arith.constant 0 : i32
    %c0_i32_1 = arith.constant 0 : i32
    return %c0_i32, %c0_i32_0 : i32, i32
  }
  func.func @transform_11(%arg0: i32) -> (i32, i32) {
    %c0_i32 = arith.constant 0 : i32
    %c0_i32_0 = arith.constant 0 : i32
    %c0_i32_1 = arith.constant 0 : i32
    return %c0_i32, %c0_i32_0 : i32, i32
  }
  func.func @transform_12(%arg0: i32) -> (i32, i32) {
    %c0_i32 = arith.constant 0 : i32
    %c0_i32_0 = arith.constant 0 : i32
    %c0_i32_1 = arith.constant 0 : i32
    return %c0_i32, %c0_i32_0 : i32, i32
  }
  func.func @transform_13(%arg0: i32) -> (i32, i32) {
    %c0_i32 = arith.constant 0 : i32
    %c0_i32_0 = arith.constant 0 : i32
    %c0_i32_1 = arith.constant 0 : i32
    return %c0_i32, %c0_i32_0 : i32, i32
  }
  func.func @transform_14(%arg0: i32) -> (i32, i32) {
    %c0_i32 = arith.constant 0 : i32
    %c0_i32_0 = arith.constant 0 : i32
    %c0_i32_1 = arith.constant 0 : i32
    return %c0_i32, %c0_i32_0 : i32, i32
  }
  func.func @transform_15(%arg0: i32) -> (i32, i32) {
    %c0_i32 = arith.constant 0 : i32
    %c0_i32_0 = arith.constant 0 : i32
    %c0_i32_1 = arith.constant 0 : i32
    return %c0_i32, %c0_i32_0 : i32, i32
  }
  func.func @transform_16(%arg0: i32) -> (i32, i32) {
    %c0_i32 = arith.constant 0 : i32
    %c0_i32_0 = arith.constant 0 : i32
    %c0_i32_1 = arith.constant 0 : i32
    return %c0_i32, %c0_i32_0 : i32, i32
  }
  func.func @transform_17(%arg0: i32) -> (i32, i32) {
    %c0_i32 = arith.constant 0 : i32
    %c0_i32_0 = arith.constant 0 : i32
    %c0_i32_1 = arith.constant 0 : i32
    return %c0_i32, %c0_i32_0 : i32, i32
  }
  func.func @transform_18(%arg0: i32) -> (i32, i32) {
    %c0_i32 = arith.constant 0 : i32
    %c0_i32_0 = arith.constant 0 : i32
    %c0_i32_1 = arith.constant 0 : i32
    return %c0_i32, %c0_i32_0 : i32, i32
  }
  func.func @transform_19(%arg0: i32) -> (i32, i32) {
    %c0_i32 = arith.constant 0 : i32
    %c0_i32_0 = arith.constant 0 : i32
    return %arg0, %c0_i32 : i32, i32
  }
}

</mosaic_0001>

<bundles_post_ra>
// kernel: dec_forward.1
= control target key start
LH: loop header
LB: loop body
LE: loop exit
PB: predicated region body
PF: predicated region fallthrough
CT: control target
= control target key end

     0   :  { %vm75_vm0 = vcmask 1044480   ;;  %vm71_vm1 = vcmask 39936   ;;  %v1058_v0 = vmov 0.0   ;;  %vm1059_vm2 = vmmov 0   ;;  %s1346_s1 = inlined_call_operand.vmem [shape: f32[5,64], index: 1, kind: input, shape index: {}]   ;;  %s1347_s0 = inlined_call_operand.vmem [shape: f32[8,5], index: 0, kind: input, shape index: {}]   ;;  %s1348_s3 = inlined_call_operand.vmem [shape: f32[64,32], index: 3, kind: input, shape index: {}]   ;;  %s1349_s5 = inlined_call_operand.vmem [shape: f32[32,16], index: 5, kind: input, shape index: {}]   ;;  %s1350_s2 = inlined_call_operand.vmem [shape: f32[1,64], index: 2, kind: input, shape index: {}]   ;;  %s1351_s4 = inlined_call_operand.vmem [shape: f32[1,32], index: 4, kind: input, shape index: {}]   ;;  %s1352_s7 = inlined_call_operand.vmem [shape: f32[16,8], index: 7, kind: input, shape index: {}]   ;;  %s1353_s6 = inlined_call_operand.vmem [shape: f32[1,16], index: 6, kind: input, shape index: {}]   ;;  %s1354_s9 = inlined_call_operand.vmem [shape: f32[8,16], index: 9, kind: input, shape index: {}]   ;;  %s1355_s8 = inlined_call_operand.vmem [shape: f32[1,8], index: 8, kind: input, shape index: {}]   ;;  %s1356_s11 = inlined_call_operand.vmem [shape: f32[16,32], index: 11, kind: input, shape index: {}]   ;;  %s1357_s10 = inlined_call_operand.vmem [shape: f32[1,16], index: 10, kind: input, shape index: {}]   ;;  %s1358_s13 = inlined_call_operand.vmem [shape: f32[32,64], index: 13, kind: input, shape index: {}]   ;;  %s1359_s15 = inlined_call_operand.vmem [shape: f32[64,5], index: 15, kind: input, shape index: {}]   ;;  %s1360_s12 = inlined_call_operand.vmem [shape: f32[1,32], index: 12, kind: input, shape index: {}]   ;;  %s1361_s17 = inlined_call_operand.vmem [shape: f32[8,4], index: 17, kind: input, shape index: {}]   ;;  %s1362_s14 = inlined_call_operand.vmem [shape: f32[1,64], index: 14, kind: input, shape index: {}]   ;;  %s1363_s18 = inlined_call_operand.vmem [shape: f32[1,4], index: 18, kind: input, shape index: {}]   ;;  %s1364_s19 = inlined_call_operand.vmem [shape: f32[8,32], index: 19, kind: output, shape index: {}]   ;;  %s1365_s16 = inlined_call_operand.vmem [shape: f32[1,5], index: 16, kind: input, shape index: {}]  }
   0x1   :  { %1368 = sst [smem:[#allocation2_spill]] %s1346_s1  ;;  %918 = vmatprep.subr.mxu0 %v1058_v0  ;;  %920 = vmatprep.mubr.msk.f32.mxu0 %vm1059_vm2, %v1058_v0  ;;  %v1060_v4 = vmov 0.0|0.0   ;;  %v859_v19 = vld [vmem:[%s1350_s2] ss:$0 sm:$0xff]  ;;  %vm165_vm3 = vcmask 523264   ;;  %vm251_vm4 = vcmask 261120  }
   0x2   :  { %1369 = sst [smem:[#allocation3_spill]] %s1347_s0  ;;  %s1372_s20 = sld [smem:[#allocation2_spill]]  ;;  %1007 = vmatprep.subr.bf16.mxu1 %v1060_v4  ;;  %939 = vmatprep.mubr.msk.f32.mxu1 %vm1059_vm2, %v1058_v0  ;;  %v862_v27 = vld [vmem:[%s1351_s4] ss:$0 sm:$0xff]  ;;  %v327_v33 = vld [vmem:[%s1352_s7 + $0x8] sm:$0xff]  ;;  %vm335_vm5 = vcmask 130048  }
   0x3   :  { %1370 = sst [smem:[#allocation4_spill]] %s1348_s3  ;;  %s1373_s22 = sld [smem:[#allocation3_spill]]  ;;  %v326_v32 = vld [vmem:[%s1352_s7] sm:$0xff]  ;;  %vm417_vm6 = vcmask 64512   ;;  %v493_v48 = vld [vmem:[%s1356_s11 + $0x8] sm:$0xff]  ;;  %v577_v58 = vld [vmem:[%s1358_s13 + $0x10] sm:$0xff] }
   0x4   :  { %1371 = sst [smem:[#allocation5_spill]] %s1349_s5  ;;  %s1374_s24 = sld [smem:[#allocation4_spill]]  ;;  %v1026_v34 = vpack.c.bf16 %v327_v33, %v326_v32  ;;  %v864_v35 = vld [vmem:[%s1353_s6] ss:$0 sm:$0xff]  ;;  %v576_v52 = vld [vmem:[%s1358_s13 + $0x8] sm:$0xff]  ;;  %v578_v59 = vld [vmem:[%s1358_s13 + $0x18] sm:$0xff] }
   0x5   :  { %s1375_s26 = sld [smem:[#allocation5_spill]]  ;;  %v409_v40 = vld [vmem:[%s1354_s9] sm:$0xff]  ;;  %s1061_s6 = smov 8   ;;  %v1035_v60 = vpack.c.bf16 %v578_v59, %v577_v58  ;;  %v661_v62 = vld [vmem:[%s1359_s15 + $0x8] sm:$0xff]  ;;  %v662_v63 = vld [vmem:[%s1359_s15 + $0x10] sm:$0xff]  ;;  %vm836_vm7 = vcmask 31744  }
   0x6   :  { %v866_v41 = vld [vmem:[%s1355_s8] ss:$0 sm:$0xff]  ;;  %842 = vst.msk [vmem:[%s1364_s19] sm:$0xff] %vm251_vm4, %v1058_v0  ;;  %vm847_vm8 = vcmask 130112   ;;  %vm853_vm9 = vcmask 162944  }
   0x7   :  { %v492_v47 = vld [vmem:[%s1356_s11] sm:$0xff] }
   0x8   :  { %v63_v1 = vld [vmem:[%s1372_s20] sm:$0x1f]  ;;  %v1029_v49 = vpack.c.bf16 %v493_v48, %v492_v47 }
   0x9   :  { %v62_v2 = vld [vmem:[%s1373_s22] sm:$0xff]  ;;  %919 = vmatpush3.msk.msra.mxu0 %vm75_vm0, %v63_v1 }
   0xa   :  { %v150_v3 = vld [vmem:[%s1374_s24] sm:$0xff]  ;;  %v151_v5 = vld [vmem:[%s1374_s24 + $0x8] sm:$0xff]  ;;  %v152_v6 = vld [vmem:[%s1374_s24 + $0x10] sm:$0xff]  ;;  %921 = vmatmul.mubr.msk.f32.vlgmr.msra.gmra.mrb[0].mxu0 %vm71_vm1, %v62_v2  ;;  %1019 = vmatprep.subr.bf16.mxu0 %v1060_v4 }
   0xb   :  { %v153_v7 = vld [vmem:[%s1374_s24 + $0x18] sm:$0xff]  ;;  %v1008_v8 = vpack.c.bf16 %v151_v5, %v150_v3  ;;  %950 = vmatprep.mubr.msk.f32.mxu0 %vm1059_vm2, %v1058_v0  ;;  %v154_v10 = vld [vmem:[%s1374_s24 + $0x20] sm:$0xff]  ;;  %v155_v11 = vld [vmem:[%s1374_s24 + $0x28] sm:$0xff] }
   0xc   :  { %v1011_v9 = vpack.c.bf16 %v153_v7, %v152_v6  ;;  %v1014_v12 = vpack.c.bf16 %v155_v11, %v154_v10  ;;  %v156_v13 = vld [vmem:[%s1374_s24 + $0x30] sm:$0xff]  ;;  %v157_v14 = vld [vmem:[%s1374_s24 + $0x38] sm:$0xff]  ;;  %v240_v16 = vld [vmem:[%s1375_s26] sm:$0xff] }
   0xd   :  { %1009 = vmatpush3.bf16.msra.mxu1 %v1008_v8  ;;  %v1017_v15 = vpack.c.bf16 %v157_v14, %v156_v13  ;;  %v241_v17 = vld [vmem:[%s1375_s26 + $0x8] sm:$0xff]  ;;  %v242_v24 = vld [vmem:[%s1375_s26 + $0x10] sm:$0xff]  ;;  %v243_v25 = vld [vmem:[%s1375_s26 + $0x18] sm:$0xff] }
   0xe   :  { %1010 = vmatprep.subr.bf16.mxu1 %v1060_v4  ;;  %v1020_v18 = vpack.c.bf16 %v241_v17, %v240_v16  ;;  %v1023_v26 = vpack.c.bf16 %v243_v25, %v242_v24  ;;  %v868_v50 = vld [vmem:[%s1357_s10] ss:$0 sm:$0xff]  ;;  %v663_v2 = vld [vmem:[%s1359_s15 + $0x18] sm:$0xff]  ;;  %v665_v6 = vld [vmem:[%s1359_s15 + $0x28] sm:$0xff] }
   0xf   :  { %v575_v51 = vld [vmem:[%s1358_s13] sm:$0xff]  ;;  %v1041_v3 = vpack.c.bf16 %v663_v2, %v662_v63  ;;  %v667_v14 = vld [vmem:[%s1359_s15 + $0x38] sm:$0xff] }
  0x10   :  { %1021 = vmatpush3.bf16.msra.mxu0 %v1020_v18  ;;  %v1032_v56 = vpack.c.bf16 %v576_v52, %v575_v51  ;;  %v660_v61 = vld [vmem:[%s1359_s15] sm:$0xff] }
  0x11   :  { %1012 = vmatpush3.bf16.msra.mxu1 %v1011_v9  ;;  %1022 = vmatprep.subr.bf16.mxu0 %v1060_v4  ;;  %v1038_v1 = vpack.c.bf16 %v661_v62, %v660_v61  ;;  %v664_v5 = vld [vmem:[%s1359_s15 + $0x20] sm:$0xff] }
  0x12   :  { %1013 = vmatprep.subr.bf16.mxu1 %v1060_v4  ;;  %v1044_v7 = vpack.c.bf16 %v665_v6, %v664_v5  ;;  %v870_v8 = vld [vmem:[%s1360_s12] ss:$0 sm:$0xff] }
  0x13   :  { %v752_v13 = vld [vmem:[%s1361_s17] sm:$0xff] }
  0x14   :  { %1024 = vmatpush3.bf16.msra.mxu0 %v1023_v26  ;;  %v872_v16 = vld [vmem:[%s1362_s14] ss:$0 sm:$0xff] }
  0x15   :  { %1015 = vmatpush3.bf16.msra.mxu1 %v1014_v12  ;;  %1025 = vmatprep.subr.bf16.mxu0 %v1060_v4  ;;  %v877_v25 = vld [vmem:[%s1363_s18] ss:$0 sm:$0xff]  ;;  %s1062_s18 = smov 16  }
  0x16   :  { %1016 = vmatprep.subr.bf16.mxu1 %v1060_v4 }
  0x19   :  { %1018 = vmatpush3.bf16.msra.mxu1 %v1017_v15 }
  0x1a   :  { %1037 = vmatprep.subr.bf16.mxu1 %v1060_v4 }
  0xdd   :  { %v145_v20 = vpop.f32.mrb[0].mxu0 }
  0xde   :  { %v146_v21 = vadd.f32 %v859_v19, %v145_v20  ;;  %v922_v22 = vpop.f32.mrb[1].mxu0 }
  0xe0   :  { %v149_v23 = vmax.f32 %v146_v21, 0.0 }
  0xe2   :  { %940 = vmatmul.mubr.msk.f32.vlgmr.msra.gmra.mrb[0].mxu1 %vm165_vm3, %v149_v23 }
  0xe3   :  { %999 = vmatprep.mubr.msk.f32.mxu1 %vm1059_vm2, %v1058_v0  ;;  %1039 = vmatpush3.bf16.msra.mxu1 %v1038_v1 }
  0xe4   :  { %1040 = vmatprep.subr.bf16.mxu1 %v1060_v4 }
  0xe7   :  { %1042 = vmatpush3.bf16.msra.mxu1 %v1041_v3 }
  0xe8   :  { %1043 = vmatprep.subr.bf16.mxu1 %v1060_v4 }
  0xeb   :  { %1045 = vmatpush3.bf16.msra.mxu1 %v1044_v7 }
  0xec   :  { %1046 = vmatprep.subr.bf16.mxu1 %v1060_v4 }
 0x1b5   :  { %v235_v28 = vpop.f32.mrb[0].mxu1 }
 0x1b6   :  { %v236_v29 = vadd.f32 %v862_v27, %v235_v28  ;;  %v941_v30 = vpop.f32.mrb[1].mxu1 }
 0x1b8   :  { %v239_v31 = vmax.f32 %v236_v29, 0.0 }
 0x1ba   :  { %951 = vmatmul.mubr.msk.f32.vlgmr.msra.gmra.mrb[2].mxu0 %vm251_vm4, %v239_v31 }
 0x1bb   :  { %957 = vmatprep.mubr.msk.f32.mxu0 %vm1059_vm2, %v1058_v0  ;;  %1027 = vmatpush3.bf16.msra.mxu0 %v1026_v34 }
 0x1bc   :  { %960 = vmatprep.subr.mxu0 %v1058_v0 }
 0x28d   :  { %v321_v36 = vpop.f32.mrb[2].mxu0 }
 0x28e   :  { %v322_v37 = vadd.f32 %v864_v35, %v321_v36  ;;  %v952_v38 = vpop.f32.mrb[3].mxu0  ;;  %v874_v35 = vld [vmem:[%s1365_s16] ss:$0 sm:$0xff] }
 0x290   :  { %v325_v39 = vmax.f32 %v322_v37, 0.0 }
 0x292   :  { %958 = vmatmul.mubr.msk.f32.vlgmr.msra.gmra.mrb[4].mxu0 %vm335_vm5, %v325_v39 }
 0x293   :  { %961 = vmatpush3.msra.mxu0 %v409_v40  ;;  %962 = vmatprep.mubr.msk.f32.mxu0 %vm1059_vm2, %v1058_v0 }
 0x294   :  { %1028 = vmatprep.subr.bf16.mxu0 %v1060_v4 }
 0x365   :  { %v405_v42 = vpop.f32.mrb[4].mxu0 }
 0x366   :  { %v406_v43 = vadd.f32 %v866_v41, %v405_v42  ;;  %v959_v44 = vpop.f32.mrb[5].mxu0 }
 0x368   :  { %844 = vrot.lane.b32.xlu1 %v406_v43, %s1061_s6  ;;  %963 = vmatmul.mubr.msk.f32.vlgmr.msra.gmra.mrb[6].mxu0 %vm417_vm6, %v406_v43  ;;  %v748_v45 = vmul.f32 %v406_v43, %v406_v43 }
 0x369   :  { %969 = vmatprep.mubr.msk.f32.mxu0 %vm1059_vm2, %v1058_v0  ;;  %1030 = vmatpush3.bf16.msra.mxu0 %v1029_v49 }
 0x36a   :  { %v749_v46 = vsel %vm417_vm6, %v748_v45, 0.0  ;;  %1031 = vmatprep.subr.bf16.mxu0 %v1060_v4 }
 0x36b   :  { %750 = vadd.xlane.f32.xlu0 %v749_v46 }
 0x3da   :  { %v845_v39 = vpop.permute.xlu1 %844 }
 0x3f8   :  { %v751_v24 = vpop.xlane.xlu0 %750 }
 0x43b   :  { %v487_v53 = vpop.f32.mrb[6].mxu0 }
 0x43c   :  { %v488_v54 = vadd.f32 %v868_v50, %v487_v53  ;;  %v964_v55 = vpop.f32.mrb[7].mxu0 }
 0x43e   :  { %v491_v57 = vmax.f32 %v488_v54, 0.0 }
 0x440   :  { %970 = vmatmul.mubr.msk.f32.vlgmr.msra.gmra.mrb[8].mxu0 %vm335_vm5, %v491_v57 }
 0x441   :  { %1033 = vmatpush3.bf16.msra.mxu0 %v1032_v56  ;;  %980 = vmatprep.mubr.msk.f32.mxu0 %vm1059_vm2, %v1058_v0 }
 0x442   :  { %1034 = vmatprep.subr.bf16.mxu0 %v1060_v4  ;;  %v666_v4 = vld [vmem:[%s1359_s15 + $0x30] sm:$0xff] }
 0x443   :  { %v1047_v15 = vpack.c.bf16 %v667_v14, %v666_v4 }
 0x445   :  { %1036 = vmatpush3.bf16.msra.mxu0 %v1035_v60  ;;  %1048 = vmatpush3.bf16.msra.mxu1 %v1047_v15 }
 0x446   :  { %1002 = vmatprep.subr.mxu0 %v1058_v0 }
 0x513   :  { %v570_v9 = vpop.f32.mrb[8].mxu0 }
 0x514   :  { %v571_v10 = vadd.f32 %v870_v8, %v570_v9  ;;  %v971_v11 = vpop.f32.mrb[9].mxu0 }
 0x516   :  { %v574_v12 = vmax.f32 %v571_v10, 0.0 }
 0x518   :  { %981 = vmatmul.mubr.msk.f32.vlgmr.msra.gmra.mrb[10].mxu0 %vm251_vm4, %v574_v12 }
 0x519   :  { %1003 = vmatpush3.msra.mxu0 %v752_v13  ;;  %1004 = vmatprep.mubr.msk.f32.mxu0 %vm1059_vm2, %v1058_v0 }
 0x51c   :  { %1005 = vmatmul.mubr.msk.f32.vlgmr.msra.gmra.mrb[12].mxu0 %vm417_vm6, %v406_v43 }
 0x5eb   :  { %v655_v17 = vpop.f32.mrb[10].mxu0 }
 0x5ec   :  { %v656_v18 = vadd.f32 %v872_v16, %v655_v17  ;;  %v982_v19 = vpop.f32.mrb[11].mxu0 }
 0x5ee   :  { %v659_v20 = vmax.f32 %v656_v18, 0.0 }
 0x5ef   :  { %v819_v21 = vpop.f32.mrb[12].mxu0 }
 0x5f0   :  { %v823_v22 = vmul.f32 2.0, %v819_v21  ;;  %1000 = vmatmul.mubr.msk.f32.vlgmr.msra.gmra.mrb[2].mxu1 %vm165_vm3, %v659_v20  ;;  %v1006_v23 = vpop.f32.mrb[13].mxu0 }
 0x5f2   :  { %v824_v26 = vsub.f32 %v751_v24, %v823_v22 }
 0x5f4   :  { %v832_v27 = vadd.f32 %v877_v25, %v824_v26 }
 0x5f6   :  { %v833_v28 = vmax.f32 %v832_v27, 0.0 }
 0x5f8   :  { %v834_v29 = vadd.f32 1.0, %v833_v28 }
 0x5fa   :  { %1054 = vrcp.f32 %v834_v29 }
 0x604   :  { %v1055_v30 = vpop.eup %1054 }
 0x605   :  { %v837_v31 = vsel %vm836_vm7, %v1055_v30, 0.0 }
 0x606   :  { %838 = vadd.xlane.f32.xlu0 %v837_v31 }
 0x693   :  { %v839_v32 = vpop.xlane.xlu0 %838 }
 0x694   :  { %1056 = vrcp.f32 %v839_v32 }
 0x69e   :  { %v1057_v33 = vpop.eup %1056 }
 0x69f   :  { %v841_v34 = vmul.f32 %v1057_v33, %v1055_v30 }
 0x6a1   :  { %850 = vrot.lane.b32.xlu1 %v841_v34, %s1062_s18 }
 0x6c3   :  { %v744_v36 = vpop.f32.mrb[2].mxu1 }
 0x6c4   :  { %v745_v37 = vadd.f32 %v874_v35, %v744_v36  ;;  %v1001_v38 = vpop.f32.mrb[3].mxu1 }
 0x6c6   :  { %843 = vst.msk [vmem:[%s1364_s19] sm:$0xff] %vm71_vm1, %v745_v37 }
 0x6c7   :  { %848 = vst.msk [vmem:[%s1364_s19] sm:$0xff] %vm847_vm8, %v845_v39 }
 0x713   :  { %v851_v0 = vpop.permute.xlu1 %850 }
 0x714   :  { %854 = vst.msk [vmem:[%s1364_s19] sm:$0xff] %vm853_vm9, %v851_v0 }

</bundles_post_ra>
